<compile_context>
chip_gen: v7x
topology: tpu7x:2x2x1
jax: 0.10.0
libtpu: 0.0.40
codegen_flags: <defaults>
</compile_context>

<pallas_src>
import jax
import jax.numpy as jnp
from jax.experimental import pallas as pl
from jax.experimental.pallas import tpu as pltpu

TAU = 0.3
INV_TAU = 1.0 / TAU
ALPHA = 0.25   # forward hard-codes the 0.25 / 0.75 weights
GAMMA = 2.0    # unused by forward (kept for fidelity with the module)
EPS = 1e-6


def _pgl_kernel(aff_ref, lbl_row_ref, lbl_col_ref, sums_ref):
    """One grid step = Bt batches of the NxN affinity plane.

    aff_ref:     VMEM [Bt, N, N]  affinity logits (native dtype, upcast here)
    lbl_row_ref: VMEM [Bt, 1, N]  has_group-folded matched labels, row view (f32)
    lbl_col_ref: VMEM [Bt, N, 1]  has_group-folded matched labels, col view (f32)
    sums_ref:    SMEM [num_blocks, 4] per-step partials
                 [pos_num, pos_den, all_num, all_den]; final reduce in JAX.
    """
    blk = pl.program_id(0)

    x = aff_ref[...].astype(jnp.float32) * INV_TAU        # (Bt, N, N) scaled logits
    lbl_r = lbl_row_ref[...]                              # (Bt, 1, N)
    lbl_c = lbl_col_ref[...]                              # (Bt, N, 1)

    # gt affinity: pair (i, j) carries the same (group_id + 1) label
    gt = (lbl_c == lbl_r).astype(jnp.float32)             # (Bt, N, N)
    # valid-pair mask (has_group_id already folded into the labels by the wrapper)
    mask = ((lbl_c != 0.0) & (lbl_r != 0.0)).astype(jnp.float32)

    # BCEWithLogitsLoss(reduction='none'), numerically stable form:
    #   l = max(x, 0) - x*y + log(1 + exp(-|x|))
    ptw = jnp.maximum(x, 0.0) - x * gt + jnp.log(1.0 + jnp.exp(-jnp.abs(x)))

    pos_mask = mask * gt          # neg_mask is recovered as (mask - pos_mask) in JAX

    # Per-step partial sums — each step owns its row, so no cross-step RMW.
    sums_ref[blk, 0] = jnp.sum(ptw * pos_mask)
    sums_ref[blk, 1] = jnp.sum(pos_mask)
    sums_ref[blk, 2] = jnp.sum(ptw * mask)
    sums_ref[blk, 3] = jnp.sum(mask)


def _round_up(v, m):
    return (v + m - 1) // m * m


def _pick_batch_tile(b, n, itemsize, budget_bytes=4 << 20):
    """Largest divisor of b whose padded single-buffer VMEM footprint fits the budget.

    Budget is conservative so the double-buffered pipeline stays well under the
    smallest scoped-VMEM default (16 MiB on v5e) without flags.
    """
    n_sub = _round_up(max(n, 1), 8)
    n_lane = _round_up(max(n, 1), 128)
    per_batch = (n_sub * n_lane * itemsize      # affinity tile
                 + 8 * n_lane * 4               # label row tile (sublane-padded f32)
                 + n_sub * 128 * 4)             # label col tile (lane-padded f32)
    max_bt = max(1, budget_bytes // per_batch)
    bt = 1
    for d in range(1, b + 1):
        if b % d == 0 and d <= max_bt:
            bt = d
    return bt, per_batch


def paragraph_grouping_loss(input_masks, input_grouping, target_masks,
                            target_grouping, matched_mask,
                            tau=TAU, alpha=ALPHA, gamma=GAMMA, eps=EPS):
    del target_masks, alpha, gamma, tau   # tau baked into the INV_TAU kernel constant
    inp_pos_idx, tgt_pos_idx, _neg_idx = matched_mask
    b, n = input_masks.shape[:2]

    # ---- plain-JAX glue: build the [B, N] matched-label table --------------
    # TODO(synk): the data-dependent scatter building `matching` has no clean
    # BlockSpec expression; it only builds a [B, N] table so it stays JAX glue.
    has_group_id = (jnp.sum(target_grouping + 1.0, axis=1) > 0).astype(jnp.float32)  # [B]
    matching = jnp.zeros((b, n, n), jnp.float32)
    matching = matching.at[inp_pos_idx[0], inp_pos_idx[1], tgt_pos_idx[1]].set(1.0)
    pred_label_gt = jnp.einsum('bij,bj->bi', matching, target_grouping + 1.0)        # [B, N]

    # Fold has_group_id into the labels: (has_g*c*r != 0) == (c' != 0) & (r' != 0)
    # with c' = has_g*c, r' = has_g*r; gt only matters where the mask is set.
    lbl = (pred_label_gt * has_group_id[:, None]).astype(jnp.float32)
    lbl_row = lbl.reshape(b, 1, n)
    lbl_col = lbl.reshape(b, n, 1)   # tiny [B,N,1] HBM stream; kept (in-kernel
                                     # lane->sublane relayout of the label row is riskier to lower)

    itemsize = jnp.dtype(input_grouping.dtype).itemsize
    bt, per_batch_bytes = _pick_batch_tile(b, n, itemsize)
    num_blocks = b // bt

    est_vmem = 2 * bt * per_batch_bytes          # double-buffered input tiles
    vmem_limit = int(min(2 * est_vmem, 100 << 20)) if est_vmem > (12 << 20) else None
    # NOTE: for very large N (single N*N plane >> scoped VMEM) the plane itself
    # would additionally need tiling along a second grid axis; not needed here.

    # ---- Pallas hot path: per-pair BCE + masked partial reductions ----------
    sums = pl.pallas_call(
        _pgl_kernel,
        out_shape=jax.ShapeDtypeStruct((num_blocks, 4), jnp.float32),
        grid_spec=pltpu.PrefetchScalarGridSpec(
            num_scalar_prefetch=0,
            grid=(num_blocks,),
            in_specs=[
                pl.BlockSpec((bt, n, n), lambda i: (i, 0, 0)),   # affinity logits (native dtype)
                pl.BlockSpec((bt, 1, n), lambda i: (i, 0, 0)),   # label row view
                pl.BlockSpec((bt, n, 1), lambda i: (i, 0, 0)),   # label col view
            ],
            out_specs=pl.BlockSpec(memory_space=pltpu.MemorySpace.SMEM),
        ),
        compiler_params=pltpu.CompilerParams(
            dimension_semantics=("arbitrary",),
            vmem_limit_bytes=vmem_limit),
    )(input_grouping, lbl_row, lbl_col)

    total = jnp.sum(sums, axis=0)                # [pos_num, pos_den, all_num, all_den]
    pos_num, pos_den = total[0], total[1]
    all_num, all_den = total[2], total[3]
    pos_loss = pos_num / (pos_den + eps)
    neg_loss = (all_num - pos_num) / ((all_den - pos_den) + eps)
    return 0.25 * pos_loss + 0.75 * neg_loss


def _reference_loss(input_masks, input_grouping, target_grouping, matched_mask,
                    tau=TAU, eps=EPS):
    """Pure-JAX reference replicating the PyTorch forward exactly."""
    inp_pos_idx, tgt_pos_idx, _ = matched_mask
    b, n = input_masks.shape[:2]
    has_group_id = (jnp.sum(target_grouping + 1.0, axis=1) > 0).astype(jnp.float32)
    has_para = has_group_id[:, None, None]
    matching = jnp.zeros((b, n, n), jnp.float32)
    matching = matching.at[inp_pos_idx[0], inp_pos_idx[1], tgt_pos_idx[1]].set(1.0)
    pred = jnp.einsum('bij,bj->bi', matching, target_grouping + 1.0)
    col, row = pred[:, :, None], pred[:, None, :]
    gt = (col == row).astype(jnp.float32)
    mask = ((has_para * col * row) != 0.0).astype(jnp.float32)
    x = input_grouping.astype(jnp.float32) / tau
    ptw = jnp.maximum(x, 0.0) - x * gt + jnp.log(1.0 + jnp.exp(-jnp.abs(x)))
    pos_mask = mask * gt
    neg_mask = mask * (1.0 - gt)
    pos_loss = jnp.sum(ptw * pos_mask) / (jnp.sum(pos_mask) + eps)
    neg_loss = jnp.sum(ptw * neg_mask) / (jnp.sum(neg_mask) + eps)
    return 0.25 * pos_loss + 0.75 * neg_loss


if __name__ == "__main__":
    key = jax.random.PRNGKey(0)
    B, N, K, H, W = 2, 8, 8, 16, 16
    k1, k2, k3, k4 = jax.random.split(key, 4)

    input_masks = jax.random.normal(k1, (B, N, H, W), jnp.float32)
    input_grouping = jax.random.normal(k2, (B, N, N), jnp.float32)   # affinity logits
    target_masks = jax.random.normal(k3, (B, K, H, W), jnp.float32)
    # group ids in {-1, 0, 1, 2}; -1 == no paragraph label
    target_grouping = jax.random.randint(k4, (B, K), -1, 3).astype(jnp.float32)

    batch_idx = jnp.array([0, 0, 0, 1, 1, 1], jnp.int32)
    inp_idx = jnp.array([0, 2, 4, 1, 3, 5], jnp.int32)
    tgt_idx = jnp.array([1, 0, 3, 2, 5, 6], jnp.int32)
    matched_mask = ((batch_idx, inp_idx), (batch_idx, tgt_idx),
                    jnp.array([7, 6], jnp.int32))  # neg_idx unused by forward

    loss = paragraph_grouping_loss(input_masks, input_grouping, target_masks,
                                   target_grouping, matched_mask)
    loss = jax.block_until_ready(loss)

    ref = _reference_loss(input_masks, input_grouping, target_grouping, matched_mask)
    assert jnp.allclose(loss, ref, rtol=1e-5, atol=1e-6), (loss, ref)

    print("KERNEL_OK")
</pallas_src>

<mosaic_0001>
module attributes {stable_mosaic.version = 11 : i64} {
  func.func @_pgl_kernel(%arg0: i32, %arg1: memref<2x8x8xf32, #tpu.memory_space<vmem>>, %arg2: memref<2x1x8xf32, #tpu.memory_space<vmem>>, %arg3: memref<2x8x1xf32, #tpu.memory_space<vmem>>, %arg4: memref<1x4xf32, #tpu.memory_space<smem>>) attributes {dimension_semantics = [#tpu.dimension_semantics<arbitrary>], iteration_bounds = array<i64: 1>, scalar_prefetch = 0 : i64, scratch_operands = 0 : i64, tpu.core_type = #tpu.core_type<tc>, window_params = [{transform_indices = @transform_0, window_bounds = array<i64: 2, 8, 8>}, {transform_indices = @transform_1, window_bounds = array<i64: 2, 1, 8>}, {transform_indices = @transform_2, window_bounds = array<i64: 2, 8, 1>}, {transform_indices = @transform_3, window_bounds = array<i64: 1, 4>}]} {
    %c0 = arith.constant 0 : index
    %c0_0 = arith.constant 0 : index
    %c0_1 = arith.constant 0 : index
    %0 = vector.load %arg1[%c0, %c0_0, %c0_1] : memref<2x8x8xf32, #tpu.memory_space<vmem>>, vector<2x8x8xf32>
    %cst = arith.constant 3.33333325 : f32
    %1 = vector.broadcast %cst : f32 to vector<2x8x8xf32>
    %2 = arith.mulf %0, %1 : vector<2x8x8xf32>
    %c0_2 = arith.constant 0 : index
    %c0_3 = arith.constant 0 : index
    %c0_4 = arith.constant 0 : index
    %3 = vector.load %arg2[%c0_2, %c0_3, %c0_4] : memref<2x1x8xf32, #tpu.memory_space<vmem>>, vector<2x1x8xf32>
    %c0_5 = arith.constant 0 : index
    %c0_6 = arith.constant 0 : index
    %c0_7 = arith.constant 0 : index
    %4 = vector.load %arg3[%c0_5, %c0_6, %c0_7] : memref<2x8x1xf32, #tpu.memory_space<vmem>>, vector<2x8x1xf32>
    %5 = vector.broadcast %4 : vector<2x8x1xf32> to vector<2x8x8xf32>
    %6 = vector.broadcast %3 : vector<2x1x8xf32> to vector<2x8x8xf32>
    %7 = arith.cmpf oeq, %5, %6 : vector<2x8x8xf32>
    %8 = arith.extui %7 : vector<2x8x8xi1> to vector<2x8x8xi32>
    %9 = arith.sitofp %8 : vector<2x8x8xi32> to vector<2x8x8xf32>
    %cst_8 = arith.constant 0.000000e+00 : f32
    %10 = vector.broadcast %cst_8 : f32 to vector<2x8x1xf32>
    %11 = arith.cmpf one, %4, %10 : vector<2x8x1xf32>
    %cst_9 = arith.constant 0.000000e+00 : f32
    %12 = vector.broadcast %cst_9 : f32 to vector<2x1x8xf32>
    %13 = arith.cmpf one, %3, %12 : vector<2x1x8xf32>
    %14 = vector.broadcast %11 : vector<2x8x1xi1> to vector<2x8x8xi1>
    %15 = vector.broadcast %13 : vector<2x1x8xi1> to vector<2x8x8xi1>
    %16 = arith.andi %14, %15 : vector<2x8x8xi1>
    %17 = arith.extui %16 : vector<2x8x8xi1> to vector<2x8x8xi32>
    %18 = arith.sitofp %17 : vector<2x8x8xi32> to vector<2x8x8xf32>
    %cst_10 = arith.constant 0.000000e+00 : f32
    %19 = vector.broadcast %cst_10 : f32 to vector<2x8x8xf32>
    %20 = arith.maximumf %2, %19 : vector<2x8x8xf32>
    %21 = arith.mulf %2, %9 : vector<2x8x8xf32>
    %22 = arith.subf %20, %21 : vector<2x8x8xf32>
    %23 = math.absf %2 : vector<2x8x8xf32>
    %cst_11 = arith.constant 0.000000e+00 : f32
    %24 = vector.broadcast %cst_11 : f32 to vector<2x8x8xf32>
    %25 = arith.subf %24, %23 : vector<2x8x8xf32>
    %26 = math.exp %25 : vector<2x8x8xf32>
    %cst_12 = arith.constant 1.000000e+00 : f32
    %27 = vector.broadcast %cst_12 : f32 to vector<2x8x8xf32>
    %28 = arith.addf %27, %26 : vector<2x8x8xf32>
    %29 = math.log %28 : vector<2x8x8xf32>
    %30 = arith.addf %22, %29 : vector<2x8x8xf32>
    %31 = arith.mulf %18, %9 : vector<2x8x8xf32>
    %32 = arith.mulf %30, %31 : vector<2x8x8xf32>
    %33 = vector.shape_cast %32 : vector<2x8x8xf32> to vector<1x2x8x8xf32>
    %cst_13 = arith.constant dense<0.000000e+00> : vector<1xf32>
    %34 = vector.multi_reduction <add>, %33, %cst_13 [1, 2, 3] : vector<1x2x8x8xf32> to vector<1xf32>
    %35 = vector.shape_cast %34 : vector<1xf32> to vector<1x1x1x1xf32>
    %36 = vector.extract %35[0, 0, 0, 0] : f32 from vector<1x1x1x1xf32>
    %37 = arith.index_cast %arg0 : i32 to index
    %c0_14 = arith.constant 0 : index
    %38 = memref.load %arg4[%37, %c0_14] : memref<1x4xf32, #tpu.memory_space<smem>>
    memref.store %36, %arg4[%37, %c0_14] : memref<1x4xf32, #tpu.memory_space<smem>>
    %39 = vector.shape_cast %31 : vector<2x8x8xf32> to vector<1x2x8x8xf32>
    %cst_15 = arith.constant dense<0.000000e+00> : vector<1xf32>
    %40 = vector.multi_reduction <add>, %39, %cst_15 [1, 2, 3] : vector<1x2x8x8xf32> to vector<1xf32>
    %41 = vector.shape_cast %40 : vector<1xf32> to vector<1x1x1x1xf32>
    %42 = vector.extract %41[0, 0, 0, 0] : f32 from vector<1x1x1x1xf32>
    %43 = arith.index_cast %arg0 : i32 to index
    %c1 = arith.constant 1 : index
    %44 = memref.load %arg4[%43, %c1] : memref<1x4xf32, #tpu.memory_space<smem>>
    memref.store %42, %arg4[%43, %c1] : memref<1x4xf32, #tpu.memory_space<smem>>
    %45 = arith.mulf %30, %18 : vector<2x8x8xf32>
    %46 = vector.shape_cast %45 : vector<2x8x8xf32> to vector<1x2x8x8xf32>
    %cst_16 = arith.constant dense<0.000000e+00> : vector<1xf32>
    %47 = vector.multi_reduction <add>, %46, %cst_16 [1, 2, 3] : vector<1x2x8x8xf32> to vector<1xf32>
    %48 = vector.shape_cast %47 : vector<1xf32> to vector<1x1x1x1xf32>
    %49 = vector.extract %48[0, 0, 0, 0] : f32 from vector<1x1x1x1xf32>
    %50 = arith.index_cast %arg0 : i32 to index
    %c2 = arith.constant 2 : index
    %51 = memref.load %arg4[%50, %c2] : memref<1x4xf32, #tpu.memory_space<smem>>
    memref.store %49, %arg4[%50, %c2] : memref<1x4xf32, #tpu.memory_space<smem>>
    %52 = vector.shape_cast %18 : vector<2x8x8xf32> to vector<1x2x8x8xf32>
    %cst_17 = arith.constant dense<0.000000e+00> : vector<1xf32>
    %53 = vector.multi_reduction <add>, %52, %cst_17 [1, 2, 3] : vector<1x2x8x8xf32> to vector<1xf32>
    %54 = vector.shape_cast %53 : vector<1xf32> to vector<1x1x1x1xf32>
    %55 = vector.extract %54[0, 0, 0, 0] : f32 from vector<1x1x1x1xf32>
    %56 = arith.index_cast %arg0 : i32 to index
    %c3 = arith.constant 3 : index
    %57 = memref.load %arg4[%56, %c3] : memref<1x4xf32, #tpu.memory_space<smem>>
    memref.store %55, %arg4[%56, %c3] : memref<1x4xf32, #tpu.memory_space<smem>>
    return
  }
  func.func @transform_0(%arg0: i32) -> (i32, i32, i32) {
    %c0_i32 = arith.constant 0 : i32
    %c0_i32_0 = arith.constant 0 : i32
    %c0_i32_1 = arith.constant 0 : i32
    return %arg0, %c0_i32, %c0_i32_0 : i32, i32, i32
  }
  func.func @transform_1(%arg0: i32) -> (i32, i32, i32) {
    %c0_i32 = arith.constant 0 : i32
    %c0_i32_0 = arith.constant 0 : i32
    %c0_i32_1 = arith.constant 0 : i32
    return %arg0, %c0_i32, %c0_i32_0 : i32, i32, i32
  }
  func.func @transform_2(%arg0: i32) -> (i32, i32, i32) {
    %c0_i32 = arith.constant 0 : i32
    %c0_i32_0 = arith.constant 0 : i32
    %c0_i32_1 = arith.constant 0 : i32
    return %arg0, %c0_i32, %c0_i32_0 : i32, i32, i32
  }
  func.func @transform_3(%arg0: i32) -> (i32, i32) {
    %c0_i32 = arith.constant 0 : i32
    %c0_i32_0 = arith.constant 0 : i32
    %c0_i32_1 = arith.constant 0 : i32
    return %c0_i32, %c0_i32_0 : i32, i32
  }
}

</mosaic_0001>

<bundles_post_ra>
// kernel: tpu_custom_call.1
= control target key start
LH: loop header
LB: loop body
LE: loop exit
PB: predicated region body
PF: predicated region fallthrough
CT: control target
= control target key end

     0   :  { %v225_v2 = vmov 0   ;;  %s286_s0 = inlined_call_operand.vmem [shape: f32[2,8,8], index: 0, kind: input, shape index: {}]   ;;  %s287_s1 = inlined_call_operand.vmem [shape: f32[2,1,8], index: 1, kind: input, shape index: {}]   ;;  %s288_s2 = inlined_call_operand.vmem [shape: f32[2,8,1], index: 2, kind: input, shape index: {}]   ;;  %s289_s3 = inlined_call_operand.hbm [shape: f32[1,4], index: 3, kind: output, shape index: {}]  }
   0x1   :  { %v21_v0 = vld [vmem:[%s288_s2] sm:$0xff]  ;;  %v22_v1 = vld [vmem:[%s288_s2 + $0x8] sm:$0xff]  ;;  %203 = vset.pattern.permute.xlu0 %v225_v2  ;;  %204 = vset.pattern.permute.xlu1 %v225_v2 }
   0x2   :  { %vm51_vm0 = vcmp.ne.f32.partialorder %v21_v0, 0.0  ;;  %vm52_vm1 = vcmp.ne.f32.partialorder %v22_v1, 0.0  ;;  %25 = vperm.xlu0 %203, %v21_v0  }
   0x3   :  { %v55_v3 = vsel %vm51_vm0, 1, %v225_v2  ;;  %v56_v4 = vsel %vm52_vm1, 1, %v225_v2 }
   0x4   :  { %58 = vperm.xlu1 %204, %v55_v3  }
   0x5   :  { %8 = vsyncpa [#allocation3], 0  ;;  %v15_v5 = vld [vmem:[%s286_s0] sm:$0xff]  ;;  %v16_v7 = vld [vmem:[%s286_s0 + $0x8] sm:$0xff]  ;;  %v35_v16 = vlaneseq  ;;  %v226_v34 = vmov 0.0   ;;  %vm109_vm12 = vcmask 64512  }
   0x6   :  { %30 = vperm.xlu0 %203, %v22_v1   ;;  %v17_v6 = vmul.f32 3.3333333, %v15_v5  ;;  %v18_v9 = vmul.f32 3.3333333, %v16_v7  ;;  %v19_v19 = vld [vmem:[%s287_s1] sm:$0x1] }
   0x7   :  { %v36_v20 = vshrl.u32 %v35_v16, 7  ;;  %vm53_vm2 = vcmp.ne.f32.partialorder %v19_v19, 0.0  ;;  %v20_v22 = vld [vmem:[%s287_s1 + $0x1] sm:$0x1]  ;;  %s213_s27 = scalar_lea.hbm %s289_s3, 16 }
   0x8   :  { %61 = vperm.xlu1 %204, %v56_v4   ;;  %v89_v8 = vand.u32 2147483647, %v17_v6  ;;  %v90_v11 = vand.u32 2147483647, %v18_v9  ;;  %v65_v24 = vsel %vm53_vm2, 1, %v225_v2  ;;  %vm54_vm3 = vcmp.ne.f32.partialorder %v20_v22, 0.0  ;;  %p214_p0 = scmp.ne.s32.totalorder %s289_s3, %s213_s27  ;;  %p217_p1 = scmp.lt.u32.totalorder %s213_s27, %s289_s3 }
   0x9   :  { %v37_v23 = vsub.s32 0, %v36_v20  ;;  %v66_v27 = vsel %vm54_vm3, 1, %v225_v2  ;;  %v83_v31 = vmax.f32 %v17_v6, 0.0  ;;  %v84_v42 = vmax.f32 %v18_v9, 0.0 }
   0xa   :  { %v91_v10 = vsub.f32 0.0, %v89_v8  ;;  %v92_v13 = vsub.f32 0.0, %v90_v11  ;;  %p219_p2 = pnand %p217_p1, %p214_p0 }
   0xb   :  { %v70_v25 = vrot.slane %v65_v24, %v37_v23  ;;  %v38_v26 = vrot.slane %v19_v19, %v37_v23  ;;  %v74_v30 = vrot.slane %v66_v27, %v37_v23  ;;  %v42_v33 = vrot.slane %v20_v22, %v37_v23 }
   0xc   :  { %v93_v12 = vmul.f32 1.442695, %v91_v10  ;;  %v95_v14 = vmul.f32 1.442695, %v92_v13 }
   0xd   :  { %vm75_vm4 = vcmp.eq.s32.totalorder %v70_v25, 1  ;;  %vm76_vm8 = vcmp.eq.s32.totalorder %v74_v30, 1 }
   0xe   :  { %205 = vpow2.f32 %v93_v12 }
   0xf   :  { %207 = vpow2.f32 %v95_v14 }
  0x18   :  { %v206_v15 = vpop.eup %205 }
  0x19   :  { %v97_v17 = vadd.f32 1.0, %v206_v15  ;;  %v208_v18 = vpop.eup %207 }
  0x1a   :  { %v98_v21 = vadd.f32 1.0, %v208_v18 }
  0x1b   :  { %209 = vlog2.f32 %v97_v17 }
  0x1c   :  { %211 = vlog2.f32 %v98_v21 }
  0x25   :  { %v210_v28 = vpop.eup %209 }
  0x26   :  { %v100_v37 = vmul.f32 0.6931472, %v210_v28  ;;  %v212_v38 = vpop.eup %211 }
  0x27   :  { %v102_v47 = vmul.f32 0.6931472, %v212_v38 }
  0x81   :  { %v26_v29 = vpop.permute.xlu0 %25 }
  0x82   :  { %vm45_vm5 = vcmp.eq.f32.partialorder %v26_v29, %v38_v26 }
  0x83   :  { %v59_v32 = vpop.permute.xlu1 %58  ;;  %v188_v35 = vsel %vm45_vm5, 1.0, %v226_v34 }
  0x84   :  { %vm63_vm6 = vcmp.eq.s32.totalorder %v59_v32, 1  ;;  %v85_v36 = vmul.f32 %v188_v35, %v17_v6 }
  0x85   :  { %vm77_vm7 = vmand %vm63_vm6, %vm75_vm4  ;;  %v31_v40 = vpop.permute.xlu0 %30 }
  0x86   :  { %v190_v39 = vsel %vm77_vm7, 1.0, %v226_v34  ;;  %v87_v41 = vsub.f32 %v83_v31, %v85_v36  ;;  %vm46_vm9 = vcmp.eq.f32.partialorder %v31_v40, %v42_v33 }
  0x87   :  { %v62_v43 = vpop.permute.xlu1 %61  ;;  %v189_v44 = vsel %vm46_vm9, 1.0, %v226_v34  ;;  %v105_v46 = vmul.f32 %v190_v39, %v188_v35  ;;  %v157_v3 = vsel %vm109_vm12, %v190_v39, 0.0 }
  0x88   :  { %vm64_vm10 = vcmp.eq.s32.totalorder %v62_v43, 1  ;;  %v86_v45 = vmul.f32 %v189_v44, %v18_v9  ;;  %v103_v48 = vadd.f32 %v100_v37, %v87_v41 }
  0x89   :  { %vm78_vm11 = vmand %vm64_vm10, %vm76_vm8  ;;  %v125_v52 = vsel %vm109_vm12, %v105_v46, 0.0 }
  0x8a   :  { %v191_v49 = vsel %vm78_vm11, 1.0, %v226_v34  ;;  %v88_v50 = vsub.f32 %v84_v42, %v86_v45  ;;  %v107_v55 = vmul.f32 %v105_v46, %v103_v48  ;;  %v140_v61 = vmul.f32 %v190_v39, %v103_v48 }
  0x8b   :  { %v106_v51 = vmul.f32 %v191_v49, %v189_v44  ;;  %v158_v2 = vsel %vm109_vm12, %v191_v49, 0.0 }
  0x8c   :  { %v104_v54 = vadd.f32 %v102_v47, %v88_v50  ;;  %v110_v59 = vsel %vm109_vm12, %v107_v55, 0.0  ;;  %v142_v0 = vsel %vm109_vm12, %v140_v61, 0.0  ;;  %v159_v4 = vadd.f32 %v158_v2, %v157_v3 }
  0x8d   :  { %v126_v53 = vsel %vm109_vm12, %v106_v51, 0.0 }
  0x8e   :  { %v127_v56 = vadd.f32 %v126_v53, %v125_v52  ;;  %v108_v57 = vmul.f32 %v106_v51, %v104_v54  ;;  %v141_v58 = vmul.f32 %v191_v49, %v104_v54 }
  0x90   :  { %128 = vadd.xlane.f32.xlu1 %v127_v56  ;;  %v111_v60 = vsel %vm109_vm12, %v108_v57, 0.0  ;;  %v143_v63 = vsel %vm109_vm12, %v141_v58, 0.0 }
  0x91   :  { %v112_v62 = vadd.f32 %v111_v60, %v110_v59  ;;  %v144_v1 = vadd.f32 %v143_v63, %v142_v0 }
  0x93   :  { %113 = vadd.xlane.f32.xlu0 %v112_v62 }
  0x97   :  { %145 = vadd.xlane.f32.xlu0 %v144_v1 }
  0x9b   :  { %160 = vadd.xlane.f32.xlu0 %v159_v4 }
 0x11d   :  { %v129_v5 = vpop.xlane.xlu1 %128 }
 0x11e   :  { %v130_v6 = vrot.slane %v129_v5, 4 }
 0x120   :  { %v131_v7 = vadd.f32 %v130_v6, %v129_v5  ;;  %v114_v8 = vpop.xlane.xlu0 %113 }
 0x121   :  { %v115_v10 = vrot.slane %v114_v8, 4 }
 0x122   :  { %v132_v9 = vrot.slane %v131_v7, 2 }
 0x123   :  { %v116_v11 = vadd.f32 %v115_v10, %v114_v8 }
 0x124   :  { %v133_v12 = vadd.f32 %v132_v9, %v131_v7  ;;  %v146_v13 = vpop.xlane.xlu0 %145 }
 0x125   :  { %v117_v14 = vrot.slane %v116_v11, 2  ;;  %v147_v15 = vrot.slane %v146_v13, 4 }
 0x126   :  { %v134_v19 = vrot.slane %v133_v12, 1 }
 0x127   :  { %v148_v16 = vadd.f32 %v147_v15, %v146_v13  ;;  %v118_v17 = vadd.f32 %v117_v14, %v116_v11 }
 0x128   :  { %v161_v18 = vpop.xlane.xlu0 %160  ;;  %v135_v26 = vadd.f32 %v134_v19, %v133_v12 }
 0x129   :  { %v149_v20 = vrot.slane %v148_v16, 2  ;;  %v162_v21 = vrot.slane %v161_v18, 4  ;;  %v119_v22 = vrot.slane %v118_v17, 1 }
 0x12b   :  { %v163_v23 = vadd.f32 %v162_v21, %v161_v18  ;;  %v120_v24 = vadd.f32 %v119_v22, %v118_v17  ;;  %v150_v25 = vadd.f32 %v149_v20, %v148_v16 }
 0x12d   :  { %v164_v27 = vrot.slane %v163_v23, 2  ;;  %192 = vpush %v120_v24  ;;  %v151_v28 = vrot.slane %v150_v25, 1 }
 0x12e   :  { %194 = vpush %v135_v26 }
 0x12f   :  { %v165_v29 = vadd.f32 %v164_v27, %v163_v23  ;;  %v152_v30 = vadd.f32 %v151_v28, %v150_v25 }
 0x131   :  { %196 = vpush %v152_v30  ;;  %v166_v31 = vrot.slane %v165_v29, 1 }
 0x133   :  { %v167_v32 = vadd.f32 %v166_v31, %v165_v29 }
 0x135   :  { %198 = vpush %v167_v32 }
 0x15e   :  { %s193_s1 = spop %192 }
 0x15f   :  { %124 = sst [smem:[#allocation2]] %s193_s1  ;;  %s195_s22 = spop %194 }
 0x160   :  { %139 = sst [smem:[#allocation2 + $0x1]] %s195_s22 }
 0x162   :  { %s197_s23 = spop %196 }
 0x163   :  { %156 = sst [smem:[#allocation2 + $0x2]] %s197_s23 }
 0x166   :  { %s199_s24 = spop %198 }
 0x167   :  { %171 = sst [smem:[#allocation2 + $0x3]] %s199_s24 }
 0x168   :  { %222 = shalt.err (!%p219_p2)
}
 0x169   :  { %s227_s5 = smov [#allocation2]  }
 0x16a   :  { %179 = dma.smem_to_hbm %s227_s5, 16, %s289_s3, [#allocation3]  }
 0x16b   :  { %223 = dma.done.wait [#allocation3], 16  }
 0x16c   :  { %224 = vsyncadd [#allocation3], 4294967280 }
 0x16d   :  { %183 = sfence }
 0x16e   :  { %184 = vsyncpa [#allocation3], 1 }

</bundles_post_ra>
